<compile_context>
chip_gen: v5e
topology: v5e:2x2
jax: 0.10.0
libtpu: 0.0.40
codegen_flags: <defaults>
</compile_context>

<pallas_src>
import functools

import jax
import jax.numpy as jnp
from jax import lax
from jax.experimental import pallas as pl
from jax.experimental.pallas import tpu as pltpu


def _leaky(v):
    return jnp.where(v > 0, v, 0.1 * v)


# -----------------------------------------------------------------------------
# Probe: is pipeline_mode=pl.Buffered(1) supported (and numerically correct) for
# constant-index operands on this build?  Halves their VMEM footprint if so.
# -----------------------------------------------------------------------------
@functools.lru_cache(maxsize=None)
def _single_buffer_supported():
    try:
        def k(x_ref, o_ref):
            o_ref[...] = x_ref[...] + 1.0

        f = pl.pallas_call(
            k,
            out_shape=jax.ShapeDtypeStruct((16, 128), jnp.float32),
            grid=(2,),
            in_specs=[pl.BlockSpec((8, 128), lambda i: (0, 0),
                                   pipeline_mode=pl.Buffered(1))],
            out_specs=pl.BlockSpec((8, 128), lambda i: (i, 0)),
        )
        x = jnp.arange(8 * 128, dtype=jnp.float32).reshape(8, 128)
        got = jax.jit(f)(x)
        expect = jnp.concatenate([x + 1.0, x + 1.0], axis=0)
        return bool(jnp.allclose(got, expect))
    except Exception:
        return False


# -----------------------------------------------------------------------------
# Fused kernel.  One grid cell = (batch element b, H-strip s of TH image rows).
#
# Refs (inputs / output):
#   x_main_ref : (1, TH*W, Cin)  strip of x (flattened rows); also the residual
#   x_top_ref  : (1, W, Cin)     image row above the strip (clamped at the top)
#   x_bot_ref  : (1, W, Cin)     image row below the strip (clamped at the bottom)
#   w1_ref     : (Cin, Cmid)     1x1 conv weight (compute dtype)
#   s1_ref, b1_ref : (1, Cmid)   folded BN1 scale / bias (f32)
#   w2_ref     : (3, 3*Cmid, Cout)  3x3 taps packed per dx: [dx, dy*Cmid + c, o]
#   s2_ref, b2_ref : (1, Cout)   folded BN2 scale / bias (f32)
#   o_ref      : (1, TH*W, Cout) output strip (Cout == Cin, residual included)
# -----------------------------------------------------------------------------
def _fused_block_kernel(x_main_ref, x_top_ref, x_bot_ref,
                        w1_ref, s1_ref, b1_ref,
                        w2_ref, s2_ref, b2_ref,
                        o_ref, *, W, TH):
    rows = TH * W
    s = pl.program_id(1)
    last = pl.num_programs(1) - 1
    cdt = w2_ref.dtype                      # MXU-input dtype (f32 or bf16)

    w1 = w1_ref[...]
    s1 = s1_ref[...]
    b1 = b1_ref[...]

    def conv1(xblk):
        y = jnp.dot(xblk, w1, preferred_element_type=jnp.float32)
        return _leaky(y * s1 + b1)          # f32 epilogue (v5e-safe)

    # ---- 1x1 conv + BN1 + leaky on the strip and the two halo rows ----------
    y_mid = conv1(x_main_ref[0])                             # (rows, Cmid) f32
    y_top = jnp.where(s > 0, conv1(x_top_ref[0]), 0.0)       # zero above image top
    y_bot = jnp.where(s < last, conv1(x_bot_ref[0]), 0.0)    # zero below image bottom

    # ---- K-packed LHS for the 3x3 conv:  y3[i] = [ y[i-W] | y[i] | y[i+W] ] --
    if TH > 1:
        y_up = jnp.concatenate([y_top, y_mid[:rows - W]], axis=0)
        y_dn = jnp.concatenate([y_mid[W:], y_bot], axis=0)
    else:
        y_up, y_dn = y_top, y_bot
    y3 = jnp.concatenate([y_up, y_mid, y_dn], axis=1).astype(cdt)   # (rows, 3*Cmid)

    # One shared, 8-row-aligned LHS; three matmuls with K = 3*Cmid (dx = 0/1/2).
    m_l = jnp.dot(y3, w2_ref[0], preferred_element_type=jnp.float32)
    m_c = jnp.dot(y3, w2_ref[1], preferred_element_type=jnp.float32)
    m_r = jnp.dot(y3, w2_ref[2], preferred_element_type=jnp.float32)

    # out[r] = m_c[r] + m_l[r-1]*(w != 0) + m_r[r+1]*(w != W-1)
    # The +-1 row shifts are XLU rolls of the results (no misaligned VMEM reads);
    # each roll's wrapped row lands on a masked (w==0 / w==W-1) output row, and the
    # masking is a jnp.where, so non-finite garbage could never leak through.
    col = lax.broadcasted_iota(jnp.int32, (rows, 1), 0) % W
    acc = m_c
    acc = acc + jnp.where(col != 0, pltpu.roll(m_l, shift=1, axis=0), 0.0)
    acc = acc + jnp.where(col != W - 1, pltpu.roll(m_r, shift=rows - 1, axis=0), 0.0)

    # ---- BN2 + leaky + residual add (re-slice x from the resident block) ----
    z = _leaky(acc * s2_ref[...] + b2_ref[...]) + x_main_ref[0].astype(jnp.float32)
    o_ref[0] = z.astype(o_ref.dtype)


# -----------------------------------------------------------------------------
# VMEM accounting + strip-height selection
# -----------------------------------------------------------------------------
def _estimate_vmem_bytes(TH, W, Cin, Cmid, Cout, act_bytes, w_nbuf):
    rows = TH * W
    est = 2 * rows * Cin * act_bytes             # x main strip (double-buffered)
    est += 2 * 2 * W * Cin * act_bytes           # top/bottom halo rows
    est += 2 * rows * Cout * act_bytes           # output strip
    est += w_nbuf * (Cin * Cmid + 9 * Cmid * Cout) * act_bytes   # conv weights
    est += w_nbuf * 2 * (Cmid + Cout) * 4                        # BN scale/bias
    # compiler-managed value temporaries (conv1 outputs, packed LHS, matmul results)
    est += rows * Cmid * 4 * 3
    est += rows * 3 * Cmid * act_bytes
    est += rows * Cout * 4 * 4
    return est


def _pick_strip_rows(H, W, Cin, Cmid, Cout, act_bytes, w_nbuf,
                     target_rows=4096, vmem_budget=24 << 20):
    """Largest TH dividing H with TH*W <= target_rows and estimated VMEM in budget."""
    best = 1
    for th in range(1, H + 1):
        if H % th:
            continue
        if th * W > target_rows:
            continue
        if _estimate_vmem_bytes(th, W, Cin, Cmid, Cout, act_bytes, w_nbuf) > vmem_budget:
            continue
        best = th
    return best


# -----------------------------------------------------------------------------
# NHWC entry point (no layout transposes -- use this if the graph is channels-last)
# -----------------------------------------------------------------------------
def basic_layers_forward_nhwc(x_nhwc, params, *, strip_rows=None,
                              target_rows=4096, vmem_budget=24 << 20):
    N, H, W, Cin = x_nhwc.shape
    Cmid = params["w1"].shape[1]
    Cout = params["w2_hwio"].shape[3]
    assert Cout == Cin, "residual block requires conv2 out_channels == in_channels"
    assert W % 8 == 0, "kernel assumes W % 8 == 0"

    cdt = x_nhwc.dtype                       # compute dtype (f32 or bf16); accum f32
    act_bytes = x_nhwc.dtype.itemsize
    single_buf = _single_buffer_supported()
    w_nbuf = 1 if single_buf else 2

    if strip_rows is None:
        TH = _pick_strip_rows(H, W, Cin, Cmid, Cout, act_bytes, w_nbuf,
                              target_rows=target_rows, vmem_budget=vmem_budget)
    else:
        TH = strip_rows
    assert H % TH == 0, "strip_rows must divide H"
    rows = TH * W
    M = H * W

    x_flat = x_nhwc.reshape(N, M, Cin)       # free, row-major reshape

    # Conv weights in the compute dtype; folded BN scale/bias stay f32.
    w1 = params["w1"].astype(cdt)
    # 3x3 taps packed for the K-packed matmul:  w2p[dx, dy*Cmid + c, o]
    w2p = jnp.transpose(params["w2_hwio"], (1, 0, 2, 3)) \
             .reshape(3, 3 * Cmid, Cout).astype(cdt)
    s1 = params["s1"].reshape(1, Cmid).astype(jnp.float32)
    b1 = params["b1"].reshape(1, Cmid).astype(jnp.float32)
    s2 = params["s2"].reshape(1, Cout).astype(jnp.float32)
    b2 = params["b2"].reshape(1, Cout).astype(jnp.float32)

    est = _estimate_vmem_bytes(TH, W, Cin, Cmid, Cout, act_bytes, w_nbuf)
    vmem_limit = max(int(est * 1.3) + (2 << 20), 8 << 20)

    def _const_spec(shape):
        n = len(shape)
        if single_buf:
            return pl.BlockSpec(shape, lambda b, s: (0,) * n,
                                pipeline_mode=pl.Buffered(1))
        return pl.BlockSpec(shape, lambda b, s: (0,) * n)

    kernel = functools.partial(_fused_block_kernel, W=W, TH=TH)

    out = pl.pallas_call(
        kernel,
        out_shape=jax.ShapeDtypeStruct((N, M, Cout), cdt),
        grid=(N, H // TH),
        in_specs=[
            # x: strip-blocked (never whole-image resident).  The same array is
            # bound three times: the main strip plus two 1-row halo blocks whose
            # block indices are clamped at the image edges; the clamped loads are
            # only consumed under a jnp.where(...) that zeroes them there.
            pl.BlockSpec((1, rows, Cin), lambda b, s: (b, s, 0)),
            pl.BlockSpec((1, W, Cin),
                         lambda b, s: (b, jnp.maximum(s * TH - 1, 0), 0)),
            pl.BlockSpec((1, W, Cin),
                         lambda b, s: (b, jnp.minimum((s + 1) * TH, H - 1), 0)),
            _const_spec((Cin, Cmid)),
            _const_spec((1, Cmid)),
            _const_spec((1, Cmid)),
            _const_spec((3, 3 * Cmid, Cout)),
            _const_spec((1, Cout)),
            _const_spec((1, Cout)),
        ],
        out_specs=pl.BlockSpec((1, rows, Cout), lambda b, s: (b, s, 0)),
        compiler_params=pltpu.CompilerParams(
            # Strips are independent (each recomputes its own 1-row conv1 halo),
            # so both axes can be megacore-sharded now that x is strip-blocked.
            dimension_semantics=("parallel", "parallel"),
            vmem_limit_bytes=vmem_limit),
    )(x_flat, x_flat, x_flat, w1, s1, b1, w2p, s2, b2)

    return out.reshape(N, H, W, Cout)


# -----------------------------------------------------------------------------
# NCHW wrapper (PyTorch layout parity).  The two transposes exist only to match
# the module's external NCHW convention; an NHWC graph should call the nhwc entry.
# -----------------------------------------------------------------------------
def basic_layers_forward(x_nchw, params, *, strip_rows=None,
                         target_rows=4096, vmem_budget=24 << 20):
    x_nhwc = jnp.transpose(x_nchw, (0, 2, 3, 1))
    z = basic_layers_forward_nhwc(x_nhwc, params, strip_rows=strip_rows,
                                  target_rows=target_rows, vmem_budget=vmem_budget)
    return jnp.transpose(z, (0, 3, 1, 2))


# -----------------------------------------------------------------------------
# Parameter construction (deterministic, synthetic) + folded eval-mode BN
# -----------------------------------------------------------------------------
def _fold_bn(conv_bias, gamma, beta, mean, var, eps=1e-5):
    scale = gamma / jnp.sqrt(var + eps)
    bias = beta + (conv_bias - mean) * scale
    return scale, bias


def init_params(key, in_channels, out_channels):
    ks = jax.random.split(key, 10)
    p = {}
    # conv1: 1x1, in->out   (stored as (Cin, Cmid))
    p["w1"] = jax.random.normal(ks[0], (in_channels, out_channels), jnp.float32) * 0.1
    b1 = jax.random.normal(ks[1], (out_channels,), jnp.float32) * 0.05
    g1 = 1.0 + 0.1 * jax.random.normal(ks[2], (out_channels,), jnp.float32)
    be1 = 0.05 * jax.random.normal(ks[3], (out_channels,), jnp.float32)
    m1 = 0.05 * jax.random.normal(ks[4], (out_channels,), jnp.float32)
    v1 = jnp.abs(1.0 + 0.1 * jax.random.normal(ks[5], (out_channels,), jnp.float32))
    p["s1"], p["b1"] = _fold_bn(b1, g1, be1, m1, v1)
    # conv2: 3x3, out->in   (HWIO)
    p["w2_hwio"] = jax.random.normal(
        ks[6], (3, 3, out_channels, in_channels), jnp.float32) * 0.1
    b2 = jax.random.normal(ks[7], (in_channels,), jnp.float32) * 0.05
    g2 = 1.0 + 0.1 * jax.random.normal(ks[8], (in_channels,), jnp.float32)
    be2 = 0.05 * jax.random.normal(ks[9], (in_channels,), jnp.float32)
    m2 = jnp.zeros((in_channels,), jnp.float32)
    v2 = jnp.ones((in_channels,), jnp.float32)
    p["s2"], p["b2"] = _fold_bn(b2, g2, be2, m2, v2)
    return p


# Plain-JAX reference (numerical sanity check).
def basic_layers_reference(x_nchw, params):
    x_nhwc = jnp.transpose(x_nchw, (0, 2, 3, 1))
    y = jnp.einsum("nhwc,co->nhwo", x_nhwc, params["w1"])
    y = _leaky(y * params["s1"] + params["b1"])
    z = lax.conv_general_dilated(
        y, params["w2_hwio"], window_strides=(1, 1), padding=((1, 1), (1, 1)),
        dimension_numbers=("NHWC", "HWIO", "NHWC"))
    z = _leaky(z * params["s2"] + params["b2"])
    z = z + x_nhwc
    return jnp.transpose(z, (0, 3, 1, 2))


if __name__ == "__main__":
    key = jax.random.PRNGKey(0)
    k_x, k_p = jax.random.split(key)

    N, C_in, H, W = 2, 8, 16, 16          # darknet residual: mid_channels = in // 2
    C_mid = 4
    x = jax.random.normal(k_x, (N, C_in, H, W), jnp.float32)
    params = init_params(k_p, C_in, C_mid)
    ref = basic_layers_reference(x, params)

    # f32, forced multi-strip (exercises halos, clamped halo index maps, masks).
    fwd_strips = jax.jit(functools.partial(basic_layers_forward, strip_rows=4))
    out_s = jax.block_until_ready(fwd_strips(x, params))
    assert out_s.shape == (N, C_in, H, W)
    assert jnp.allclose(out_s, ref, atol=5e-4, rtol=1e-3), "f32 multi-strip mismatch"

    # f32, auto strip selection (single strip at this size).
    fwd_auto = jax.jit(basic_layers_forward)
    out_a = jax.block_until_ready(fwd_auto(x, params))
    assert jnp.allclose(out_a, ref, atol=5e-4, rtol=1e-3), "f32 auto-strip mismatch"

    # bf16 activations/weights with f32 accumulation (perf-review item); loose tol.
    fwd_bf16 = jax.jit(functools.partial(basic_layers_forward, strip_rows=8))
    out_b = jax.block_until_ready(fwd_bf16(x.astype(jnp.bfloat16), params))
    assert out_b.dtype == jnp.bfloat16
    assert jnp.allclose(out_b.astype(jnp.float32), ref, atol=1.5e-1, rtol=5e-2), \
        "bf16 mismatch vs f32 reference"

    print("KERNEL_OK")
</pallas_src>

<mosaic_0001>
module attributes {stable_mosaic.version = 11 : i64} {
  func.func @k(%arg0: i32, %arg1: memref<8x128xf32, #tpu.memory_space<vmem>>, %arg2: memref<8x128xf32, #tpu.memory_space<vmem>>) attributes {dimension_semantics = [#tpu.dimension_semantics<arbitrary>], iteration_bounds = array<i64: 2>, scalar_prefetch = 0 : i64, scratch_operands = 0 : i64, tpu.core_type = #tpu.core_type<tc>, window_params = [{pipeline_mode = #tpu.pipeline_mode<synchronous>, transform_indices = @transform_0, window_bounds = array<i64: 8, 128>}, {transform_indices = @transform_1, window_bounds = array<i64: 8, 128>}]} {
    %c0 = arith.constant 0 : index
    %c0_0 = arith.constant 0 : index
    %0 = vector.load %arg1[%c0, %c0_0] : memref<8x128xf32, #tpu.memory_space<vmem>>, vector<8x128xf32>
    %cst = arith.constant 1.000000e+00 : f32
    %1 = vector.broadcast %cst : f32 to vector<8x128xf32>
    %2 = arith.addf %0, %1 : vector<8x128xf32>
    %c0_1 = arith.constant 0 : index
    %c0_2 = arith.constant 0 : index
    %3 = vector.load %arg2[%c0_1, %c0_2] : memref<8x128xf32, #tpu.memory_space<vmem>>, vector<8x128xf32>
    tpu.vector_store %arg2[%c0_1, %c0_2], %2 {strides = array<i32>} : memref<8x128xf32, #tpu.memory_space<vmem>>, vector<8x128xf32>,
    return
  }
  func.func @transform_0(%arg0: i32) -> (i32, i32) {
    %c0_i32 = arith.constant 0 : i32
    %c0_i32_0 = arith.constant 0 : i32
    %c0_i32_1 = arith.constant 0 : i32
    return %c0_i32, %c0_i32_0 : i32, i32
  }
  func.func @transform_1(%arg0: i32) -> (i32, i32) {
    %c0_i32 = arith.constant 0 : i32
    %c0_i32_0 = arith.constant 0 : i32
    return %arg0, %c0_i32 : i32, i32
  }
}

module attributes {stable_mosaic.version = 11 : i64} {
  func.func @_fused_block_kernel(%arg0: i32, %arg1: i32, %arg2: memref<1x64x8xf32, #tpu.memory_space<vmem>>, %arg3: memref<1x16x8xf32, #tpu.memory_space<vmem>>, %arg4: memref<1x16x8xf32, #tpu.memory_space<vmem>>, %arg5: memref<8x4xf32, #tpu.memory_space<vmem>>, %arg6: memref<1x4xf32, #tpu.memory_space<vmem>>, %arg7: memref<1x4xf32, #tpu.memory_space<vmem>>, %arg8: memref<3x12x8xf32, #tpu.memory_space<vmem>>, %arg9: memref<1x8xf32, #tpu.memory_space<vmem>>, %arg10: memref<1x8xf32, #tpu.memory_space<vmem>>, %arg11: memref<1x64x8xf32, #tpu.memory_space<vmem>>) attributes {dimension_semantics = [#tpu.dimension_semantics<parallel>, #tpu.dimension_semantics<parallel>], iteration_bounds = array<i64: 2, 4>, scalar_prefetch = 0 : i64, scratch_operands = 0 : i64, tpu.core_type = #tpu.core_type<tc>, window_params = [{transform_indices = @transform_0, window_bounds = array<i64: 1, 64, 8>}, {transform_indices = @transform_1, window_bounds = array<i64: 1, 16, 8>}, {transform_indices = @transform_2, window_bounds = array<i64: 1, 16, 8>}, {pipeline_mode = #tpu.pipeline_mode<synchronous>, transform_indices = @transform_3, window_bounds = array<i64: 8, 4>}, {pipeline_mode = #tpu.pipeline_mode<synchronous>, transform_indices = @transform_4, window_bounds = array<i64: 1, 4>}, {pipeline_mode = #tpu.pipeline_mode<synchronous>, transform_indices = @transform_5, window_bounds = array<i64: 1, 4>}, {pipeline_mode = #tpu.pipeline_mode<synchronous>, transform_indices = @transform_6, window_bounds = array<i64: 3, 12, 8>}, {pipeline_mode = #tpu.pipeline_mode<synchronous>, transform_indices = @transform_7, window_bounds = array<i64: 1, 8>}, {pipeline_mode = #tpu.pipeline_mode<synchronous>, transform_indices = @transform_8, window_bounds = array<i64: 1, 8>}, {transform_indices = @transform_9, window_bounds = array<i64: 1, 64, 8>}]} {
    %c0 = arith.constant 0 : index
    %c0_0 = arith.constant 0 : index
    %0 = vector.load %arg5[%c0, %c0_0] : memref<8x4xf32, #tpu.memory_space<vmem>>, vector<8x4xf32>
    %c0_1 = arith.constant 0 : index
    %c0_2 = arith.constant 0 : index
    %1 = vector.load %arg6[%c0_1, %c0_2] : memref<1x4xf32, #tpu.memory_space<vmem>>, vector<1x4xf32>
    %c0_3 = arith.constant 0 : index
    %c0_4 = arith.constant 0 : index
    %2 = vector.load %arg7[%c0_3, %c0_4] : memref<1x4xf32, #tpu.memory_space<vmem>>, vector<1x4xf32>
    %c0_5 = arith.constant 0 : index
    %c0_6 = arith.constant 0 : index
    %c0_7 = arith.constant 0 : index
    %3 = vector.load %arg2[%c0_5, %c0_6, %c0_7] : memref<1x64x8xf32, #tpu.memory_space<vmem>>, vector<1x64x8xf32>
    %4 = vector.shape_cast %3 : vector<1x64x8xf32> to vector<64x8xf32>
    %cst = arith.constant dense<0.000000e+00> : vector<64x4xf32>
    %5 = tpu.matmul %4, %0, %cst {dimension_numbers = #tpu.dot_dimension_numbers<[1], [0], [0], [1], [0, 0, 1, 1], [], []>} : vector<64x8xf32>, vector<8x4xf32>, vector<64x4xf32> -> vector<64x4xf32>
    %6 = vector.broadcast %1 : vector<1x4xf32> to vector<64x4xf32>
    %7 = arith.mulf %5, %6 : vector<64x4xf32>
    %8 = vector.broadcast %2 : vector<1x4xf32> to vector<64x4xf32>
    %9 = arith.addf %7, %8 : vector<64x4xf32>
    %cst_8 = arith.constant 0.000000e+00 : f32
    %10 = vector.broadcast %cst_8 : f32 to vector<64x4xf32>
    %11 = arith.cmpf ogt, %9, %10 : vector<64x4xf32>
    %cst_9 = arith.constant 1.000000e-01 : f32
    %12 = vector.broadcast %cst_9 : f32 to vector<64x4xf32>
    %13 = arith.mulf %12, %9 : vector<64x4xf32>
    %14 = arith.select %11, %9, %13 : vector<64x4xi1>, vector<64x4xf32>
    %c0_i32 = arith.constant 0 : i32
    %15 = arith.cmpi sgt, %arg1, %c0_i32 : i32
    %c0_10 = arith.constant 0 : index
    %c0_11 = arith.constant 0 : index
    %c0_12 = arith.constant 0 : index
    %16 = vector.load %arg3[%c0_10, %c0_11, %c0_12] : memref<1x16x8xf32, #tpu.memory_space<vmem>>, vector<1x16x8xf32>
    %17 = vector.shape_cast %16 : vector<1x16x8xf32> to vector<16x8xf32>
    %cst_13 = arith.constant dense<0.000000e+00> : vector<16x4xf32>
    %18 = tpu.matmul %17, %0, %cst_13 {dimension_numbers = #tpu.dot_dimension_numbers<[1], [0], [0], [1], [0, 0, 1, 1], [], []>} : vector<16x8xf32>, vector<8x4xf32>, vector<16x4xf32> -> vector<16x4xf32>
    %19 = vector.broadcast %1 : vector<1x4xf32> to vector<16x4xf32>
    %20 = arith.mulf %18, %19 : vector<16x4xf32>
    %21 = vector.broadcast %2 : vector<1x4xf32> to vector<16x4xf32>
    %22 = arith.addf %20, %21 : vector<16x4xf32>
    %cst_14 = arith.constant 0.000000e+00 : f32
    %23 = vector.broadcast %cst_14 : f32 to vector<16x4xf32>
    %24 = arith.cmpf ogt, %22, %23 : vector<16x4xf32>
    %cst_15 = arith.constant 1.000000e-01 : f32
    %25 = vector.broadcast %cst_15 : f32 to vector<16x4xf32>
    %26 = arith.mulf %25, %22 : vector<16x4xf32>
    %27 = arith.select %24, %22, %26 : vector<16x4xi1>, vector<16x4xf32>
    %cst_16 = arith.constant 0.000000e+00 : f32
    %28 = vector.broadcast %cst_16 : f32 to vector<16x4xf32>
    %29 = arith.select %15, %27, %28 : vector<16x4xf32>
    %c3_i32 = arith.constant 3 : i32
    %30 = arith.cmpi slt, %arg1, %c3_i32 : i32
    %c0_17 = arith.constant 0 : index
    %c0_18 = arith.constant 0 : index
    %c0_19 = arith.constant 0 : index
    %31 = vector.load %arg4[%c0_17, %c0_18, %c0_19] : memref<1x16x8xf32, #tpu.memory_space<vmem>>, vector<1x16x8xf32>
    %32 = vector.shape_cast %31 : vector<1x16x8xf32> to vector<16x8xf32>
    %cst_20 = arith.constant dense<0.000000e+00> : vector<16x4xf32>
    %33 = tpu.matmul %32, %0, %cst_20 {dimension_numbers = #tpu.dot_dimension_numbers<[1], [0], [0], [1], [0, 0, 1, 1], [], []>} : vector<16x8xf32>, vector<8x4xf32>, vector<16x4xf32> -> vector<16x4xf32>
    %34 = vector.broadcast %1 : vector<1x4xf32> to vector<16x4xf32>
    %35 = arith.mulf %33, %34 : vector<16x4xf32>
    %36 = vector.broadcast %2 : vector<1x4xf32> to vector<16x4xf32>
    %37 = arith.addf %35, %36 : vector<16x4xf32>
    %cst_21 = arith.constant 0.000000e+00 : f32
    %38 = vector.broadcast %cst_21 : f32 to vector<16x4xf32>
    %39 = arith.cmpf ogt, %37, %38 : vector<16x4xf32>
    %cst_22 = arith.constant 1.000000e-01 : f32
    %40 = vector.broadcast %cst_22 : f32 to vector<16x4xf32>
    %41 = arith.mulf %40, %37 : vector<16x4xf32>
    %42 = arith.select %39, %37, %41 : vector<16x4xi1>, vector<16x4xf32>
    %cst_23 = arith.constant 0.000000e+00 : f32
    %43 = vector.broadcast %cst_23 : f32 to vector<16x4xf32>
    %44 = arith.select %30, %42, %43 : vector<16x4xf32>
    %45 = vector.extract_strided_slice %14 {offsets = [0, 0], sizes = [48, 4], strides = [1, 1]} : vector<64x4xf32> to vector<48x4xf32>
    %46 = tpu.concatenate %29, %45 in 0 : vector<16x4xf32>, vector<48x4xf32> -> vector<64x4xf32>
    %47 = vector.extract_strided_slice %14 {offsets = [16, 0], sizes = [48, 4], strides = [1, 1]} : vector<64x4xf32> to vector<48x4xf32>
    %48 = tpu.concatenate %47, %44 in 0 : vector<48x4xf32>, vector<16x4xf32> -> vector<64x4xf32>
    %49 = tpu.concatenate %46, %14, %48 in 1 : vector<64x4xf32>, vector<64x4xf32>, vector<64x4xf32> -> vector<64x12xf32>
    %c0_24 = arith.constant 0 : index
    %c0_25 = arith.constant 0 : index
    %c0_26 = arith.constant 0 : index
    %50 = vector.load %arg8[%c0_24, %c0_25, %c0_26] : memref<3x12x8xf32, #tpu.memory_space<vmem>>, vector<1x12x8xf32>
    %51 = vector.shape_cast %50 : vector<1x12x8xf32> to vector<12x8xf32>
    %cst_27 = arith.constant dense<0.000000e+00> : vector<64x8xf32>
    %52 = tpu.matmul %49, %51, %cst_27 {dimension_numbers = #tpu.dot_dimension_numbers<[1], [0], [0], [1], [0, 0, 1, 1], [], []>} : vector<64x12xf32>, vector<12x8xf32>, vector<64x8xf32> -> vector<64x8xf32>
    %c1 = arith.constant 1 : index
    %c0_28 = arith.constant 0 : index
    %c0_29 = arith.constant 0 : index
    %53 = vector.load %arg8[%c1, %c0_28, %c0_29] : memref<3x12x8xf32, #tpu.memory_space<vmem>>, vector<1x12x8xf32>
    %54 = vector.shape_cast %53 : vector<1x12x8xf32> to vector<12x8xf32>
    %cst_30 = arith.constant dense<0.000000e+00> : vector<64x8xf32>
    %55 = tpu.matmul %49, %54, %cst_30 {dimension_numbers = #tpu.dot_dimension_numbers<[1], [0], [0], [1], [0, 0, 1, 1], [], []>} : vector<64x12xf32>, vector<12x8xf32>, vector<64x8xf32> -> vector<64x8xf32>
    %c2 = arith.constant 2 : index
    %c0_31 = arith.constant 0 : index
    %c0_32 = arith.constant 0 : index
    %56 = vector.load %arg8[%c2, %c0_31, %c0_32] : memref<3x12x8xf32, #tpu.memory_space<vmem>>, vector<1x12x8xf32>
    %57 = vector.shape_cast %56 : vector<1x12x8xf32> to vector<12x8xf32>
    %cst_33 = arith.constant dense<0.000000e+00> : vector<64x8xf32>
    %58 = tpu.matmul %49, %57, %cst_33 {dimension_numbers = #tpu.dot_dimension_numbers<[1], [0], [0], [1], [0, 0, 1, 1], [], []>} : vector<64x12xf32>, vector<12x8xf32>, vector<64x8xf32> -> vector<64x8xf32>
    %59 = tpu.iota {dimensions = array<i32: 0>} : vector<64x1xi32>
    %c16_i32 = arith.constant 16 : i32
    %c0_i32_34 = arith.constant 0 : i32
    %60 = arith.cmpi eq, %c16_i32, %c0_i32_34 : i32
    %c1_i32 = arith.constant 1 : i32
    %61 = arith.select %60, %c1_i32, %c16_i32 : i32
    %62 = vector.broadcast %61 : i32 to vector<64x1xi32>
    %63 = arith.remsi %59, %62 : vector<64x1xi32>
    %c0_i32_35 = arith.constant 0 : i32
    %64 = vector.broadcast %c0_i32_35 : i32 to vector<64x1xi32>
    %65 = arith.cmpi ne, %63, %64 : vector<64x1xi32>
    %c0_i32_36 = arith.constant 0 : i32
    %66 = vector.broadcast %c0_i32_36 : i32 to vector<64x1xi32>
    %67 = arith.cmpi slt, %63, %66 : vector<64x1xi32>
    %c0_i32_37 = arith.constant 0 : i32
    %68 = arith.cmpi slt, %61, %c0_i32_37 : i32
    %69 = vector.broadcast %68 : i1 to vector<64x1xi1>
    %70 = vector.broadcast %69 : vector<64x1xi1> to vector<64x1xi1>
    %71 = arith.xori %67, %70 : vector<64x1xi1>
    %72 = arith.andi %71, %65 : vector<64x1xi1>
    %73 = vector.broadcast %61 : i32 to vector<64x1xi32>
    %74 = arith.addi %63, %73 : vector<64x1xi32>
    %75 = arith.select %72, %74, %63 : vector<64x1xi1>, vector<64x1xi32>
    %c0_i32_38 = arith.constant 0 : i32
    %76 = vector.broadcast %c0_i32_38 : i32 to vector<64x1xi32>
    %77 = arith.cmpi ne, %75, %76 : vector<64x1xi32>
    %c1_i32_39 = arith.constant 1 : i32
    %78 = tpu.dynamic_rotate %52 by %c1_i32_39 dim 0 : vector<64x8xf32>, i32 -> vector<64x8xf32>
    %cst_40 = arith.constant 0.000000e+00 : f32
    %79 = vector.shape_cast %77 : vector<64x1xi1> to vector<64x1xi1>
    %80 = vector.broadcast %79 : vector<64x1xi1> to vector<64x8xi1>
    %81 = vector.broadcast %cst_40 : f32 to vector<64x8xf32>
    %82 = arith.select %80, %78, %81 : vector<64x8xi1>, vector<64x8xf32>
    %83 = arith.addf %55, %82 : vector<64x8xf32>
    %c15_i32 = arith.constant 15 : i32
    %84 = vector.broadcast %c15_i32 : i32 to vector<64x1xi32>
    %85 = arith.cmpi ne, %75, %84 : vector<64x1xi32>
    %c63_i32 = arith.constant 63 : i32
    %86 = tpu.dynamic_rotate %58 by %c63_i32 dim 0 : vector<64x8xf32>, i32 -> vector<64x8xf32>
    %cst_41 = arith.constant 0.000000e+00 : f32
    %87 = vector.shape_cast %85 : vector<64x1xi1> to vector<64x1xi1>
    %88 = vector.broadcast %87 : vector<64x1xi1> to vector<64x8xi1>
    %89 = vector.broadcast %cst_41 : f32 to vector<64x8xf32>
    %90 = arith.select %88, %86, %89 : vector<64x8xi1>, vector<64x8xf32>
    %91 = arith.addf %83, %90 : vector<64x8xf32>
    %c0_42 = arith.constant 0 : index
    %c0_43 = arith.constant 0 : index
    %92 = vector.load %arg9[%c0_42, %c0_43] : memref<1x8xf32, #tpu.memory_space<vmem>>, vector<1x8xf32>
    %93 = vector.broadcast %92 : vector<1x8xf32> to vector<64x8xf32>
    %94 = arith.mulf %91, %93 : vector<64x8xf32>
    %c0_44 = arith.constant 0 : index
    %c0_45 = arith.constant 0 : index
    %95 = vector.load %arg10[%c0_44, %c0_45] : memref<1x8xf32, #tpu.memory_space<vmem>>, vector<1x8xf32>
    %96 = vector.broadcast %95 : vector<1x8xf32> to vector<64x8xf32>
    %97 = arith.addf %94, %96 : vector<64x8xf32>
    %cst_46 = arith.constant 0.000000e+00 : f32
    %98 = vector.broadcast %cst_46 : f32 to vector<64x8xf32>
    %99 = arith.cmpf ogt, %97, %98 : vector<64x8xf32>
    %cst_47 = arith.constant 1.000000e-01 : f32
    %100 = vector.broadcast %cst_47 : f32 to vector<64x8xf32>
    %101 = arith.mulf %100, %97 : vector<64x8xf32>
    %102 = arith.select %99, %97, %101 : vector<64x8xi1>, vector<64x8xf32>
    %c0_48 = arith.constant 0 : index
    %c0_49 = arith.constant 0 : index
    %c0_50 = arith.constant 0 : index
    %103 = vector.load %arg2[%c0_48, %c0_49, %c0_50] : memref<1x64x8xf32, #tpu.memory_space<vmem>>, vector<1x64x8xf32>
    %104 = vector.shape_cast %103 : vector<1x64x8xf32> to vector<64x8xf32>
    %105 = arith.addf %102, %104 : vector<64x8xf32>
    %c0_51 = arith.constant 0 : index
    %c0_52 = arith.constant 0 : index
    %c0_53 = arith.constant 0 : index
    %106 = vector.load %arg11[%c0_51, %c0_52, %c0_53] : memref<1x64x8xf32, #tpu.memory_space<vmem>>, vector<1x64x8xf32>
    %107 = vector.shape_cast %106 : vector<1x64x8xf32> to vector<64x8xf32>
    %108 = vector.shape_cast %105 : vector<64x8xf32> to vector<1x64x8xf32>
    tpu.vector_store %arg11[%c0_51, %c0_52, %c0_53], %108 {strides = array<i32>} : memref<1x64x8xf32, #tpu.memory_space<vmem>>, vector<1x64x8xf32>,
    return
  }
  func.func @transform_0(%arg0: i32, %arg1: i32) -> (i32, i32, i32) {
    %c0_i32 = arith.constant 0 : i32
    %c0_i32_0 = arith.constant 0 : i32
    return %arg0, %arg1, %c0_i32 : i32, i32, i32
  }
  func.func @transform_1(%arg0: i32, %arg1: i32) -> (i32, i32, i32) {
    %c4_i32 = arith.constant 4 : i32
    %0 = arith.muli %arg1, %c4_i32 : i32
    %c1_i32 = arith.constant 1 : i32
    %1 = arith.subi %0, %c1_i32 : i32
    %c0_i32 = arith.constant 0 : i32
    %2 = arith.maxsi %1, %c0_i32 : i32
    %c0_i32_0 = arith.constant 0 : i32
    %c0_i32_1 = arith.constant 0 : i32
    return %arg0, %2, %c0_i32_0 : i32, i32, i32
  }
  func.func @transform_2(%arg0: i32, %arg1: i32) -> (i32, i32, i32) {
    %c1_i32 = arith.constant 1 : i32
    %0 = arith.addi %arg1, %c1_i32 : i32
    %c4_i32 = arith.constant 4 : i32
    %1 = arith.muli %0, %c4_i32 : i32
    %c15_i32 = arith.constant 15 : i32
    %2 = arith.minsi %1, %c15_i32 : i32
    %c0_i32 = arith.constant 0 : i32
    %c0_i32_0 = arith.constant 0 : i32
    return %arg0, %2, %c0_i32 : i32, i32, i32
  }
  func.func @transform_3(%arg0: i32, %arg1: i32) -> (i32, i32) {
    %c0_i32 = arith.constant 0 : i32
    %c0_i32_0 = arith.constant 0 : i32
    %c0_i32_1 = arith.constant 0 : i32
    return %c0_i32, %c0_i32_0 : i32, i32
  }
  func.func @transform_4(%arg0: i32, %arg1: i32) -> (i32, i32) {
    %c0_i32 = arith.constant 0 : i32
    %c0_i32_0 = arith.constant 0 : i32
    %c0_i32_1 = arith.constant 0 : i32
    return %c0_i32, %c0_i32_0 : i32, i32
  }
  func.func @transform_5(%arg0: i32, %arg1: i32) -> (i32, i32) {
    %c0_i32 = arith.constant 0 : i32
    %c0_i32_0 = arith.constant 0 : i32
    %c0_i32_1 = arith.constant 0 : i32
    return %c0_i32, %c0_i32_0 : i32, i32
  }
  func.func @transform_6(%arg0: i32, %arg1: i32) -> (i32, i32, i32) {
    %c0_i32 = arith.constant 0 : i32
    %c0_i32_0 = arith.constant 0 : i32
    %c0_i32_1 = arith.constant 0 : i32
    %c0_i32_2 = arith.constant 0 : i32
    return %c0_i32, %c0_i32_0, %c0_i32_1 : i32, i32, i32
  }
  func.func @transform_7(%arg0: i32, %arg1: i32) -> (i32, i32) {
    %c0_i32 = arith.constant 0 : i32
    %c0_i32_0 = arith.constant 0 : i32
    %c0_i32_1 = arith.constant 0 : i32
    return %c0_i32, %c0_i32_0 : i32, i32
  }
  func.func @transform_8(%arg0: i32, %arg1: i32) -> (i32, i32) {
    %c0_i32 = arith.constant 0 : i32
    %c0_i32_0 = arith.constant 0 : i32
    %c0_i32_1 = arith.constant 0 : i32
    return %c0_i32, %c0_i32_0 : i32, i32
  }
  func.func @transform_9(%arg0: i32, %arg1: i32) -> (i32, i32, i32) {
    %c0_i32 = arith.constant 0 : i32
    %c0_i32_0 = arith.constant 0 : i32
    return %arg0, %arg1, %c0_i32 : i32, i32, i32
  }
}

</mosaic_0001>

<bundles_post_ra>
// kernel: tpu_custom_call.1
= control target key start
LH: loop header
LB: loop body
LE: loop exit
PB: predicated region body
PF: predicated region fallthrough
CT: control target
= control target key end

     0   :  { %6 = vsyncpa [#allocation3], 0  ;;  %s441_s0 = inlined_call_operand.hbm [shape: f32[8,128], index: 0, kind: input, shape index: {}]   ;;  %s442_s1 = inlined_call_operand.hbm [shape: f32[16,128], index: 1, kind: output, shape index: {}]  }
   0x1   :  { %7 = vsyncpa [#allocation4], 0 }
   0x2   :  { %9 = vsyncpa [#allocation4 + $0x1], 0  ;;  %s357_s6 = smov 0   ;;  %s359_s7 = smov 0  }
   0x3   :  { %s361_s8 = smov 0   ;;  %s363_s9 = smov 0  }
   0x4 LB: > { %s378_s10 = sadd.s32 4294967295, %s344_s9   ;;  %s188_s11 = sadd.s32 4294967294, %s344_s9   ;;  %s344_s9 = sphi %s363_s9, %s448_s9   ;;  %s340_s8 = sphi %s361_s8, %s447_s8   ;;  %s336_s7 = sphi %s359_s7, %s446_s7   ;;  %s332_s6 = sphi %s357_s6, %s445_s6  }
   0x5   : > { %s382_s12 = sadd.s32 1, %s344_s9   ;;  %s43_s13 = sadd.s32 1, %s340_s8 }
   0x6   : > { %s40_s14 = ssub.s32 %s344_s9, %s382_s12  ;;  %p53_p0 = scmp.ne.s32.totalorder %s340_s8, %s336_s7 }
   0x7   : > { %p41_p1 = scmp.eq.s32.totalorder %s40_s14, 0  ;;  %p54_p2 = scmp.eq.s32.totalorder %s378_s10, 1 }
   0x8   : > { %p59_p3 = scmp.ne.s32.totalorder %s336_s7, %s332_s6  ;;  %p60_p4 = scmp.eq.s32.totalorder %s188_s11, 1 }
   0x9   : > { %s393_s15 = scalar_select %p41_p1, %s340_s8, %s43_s13  }
   0xa   : > { %p395_p5 = por %p54_p2, %p53_p0  ;;  %p399_p6 = por %p60_p4, %p59_p3 }
   0xb   : > { %p189_p7 = scmp.ge.s32.totalorder %s344_s9, 1  ;;  %p67_p8 = scmp.lt.s32.totalorder %s344_s9, 3 }
   0xc   : > { %p212_p9 = scmp.eq.s32.totalorder %s378_s10, 0  ;;  %s79_s20 = sshll.u32 %s441_s0, 4  ;;  %s80_s20 = int_to_ptr.hbm [resolvable:$true] %s79_s20 }
   0xd   : > { %p68_p10 = pnand %p189_p7, %p67_p8  ;;  %s346_s21 = smov [#allocation2]  }
   0xe   : > { %s81_s22 = sshll.u32 %s346_s21, 4  ;;  %s82_s22 = int_to_ptr.vmem [resolvable:$true] %s81_s22 }
   0xf   : > { %p204_p11 = pneg %p68_p10  ;;  %94 = sbr.rel (%p68_p10) target bundleno = 37 (0x25), region = 24 }
  0x11   : > { %p205_p12 = pnand %p212_p9, %p204_p11 }
  0x13   : > { %207 = dma.hbm_to_vmem [thread:$0]  (!%p205_p12), %s80_s20, 128, %s82_s22, [#allocation3]  }
  0x14   : > { %323 = dma.done.wait (%p212_p9), [#allocation3], 128  }
  0x15   : > { %325 = vsyncadd (%p212_p9), [#allocation3], 4294967168  ;;  %s107_s23 = sand.u32 1, %s336_s7   ;;  %s195_s24 = sshll.u32 %s378_s10, 3  ;;  %v110_v0 = vld [vmem:[#allocation2] sm:$0xff] }
  0x16   : > { %s193_s25 = sshll.u32 %s107_s23, 3  ;;  %s124_s28 = scalar_lea.hbm %s442_s1, %s195_s24  ;;  %v111_v1 = vadd.f32 1.0, %v110_v0 }
  0x17   : > { %s109_s29 = scalar_lea.vmem [#allocation5], %s193_s25  ;;  %s128_s2 = sshll.u32 %s124_s28, 4  ;;  %s129_s2 = int_to_ptr.hbm [resolvable:$true] %s128_s2 }
  0x18   : > { %s126_s30 = sshll.u32 %s109_s29, 4  ;;  %112 = vst [vmem:[%s109_s29] sm:$0xff] %v111_v1  ;;  %s114_s3 = scalar_lea.sflag [#allocation4], %s107_s23  ;;  %s127_s30 = int_to_ptr.vmem [resolvable:$true] %s126_s30 }
  0x19   : > { %s292_s4 = sshra.s32 %s129_s2, 4  ;;  %s298_s13 = scalar_lea.hbm %s442_s1, 16  ;;  %s293_s4 = int_to_ptr.hbm [resolvable:$true] %s292_s4 }
  0x1a   : > { %s294_s5 = scalar_lea.hbm %s293_s4, 8  ;;  %p299_p2 = scmp.lt.s32.totalorder %s293_s4, %s442_s1 }
  0x1b   : > { %p295_p13 = scmp.ne.s32.totalorder %s293_s4, %s294_s5  ;;  %p300_p3 = scmp.lt.s32.totalorder %s298_s13, %s294_s5 }
  0x1d   : > { %p296_p0 = pnand %p295_p13, %p395_p5  ;;  %p301_p4 = por %p300_p3, %p299_p2 }
  0x1f   : > { %p297_p1 = pneg %p296_p0 }
  0x21   : > { %p302_p7 = pnand %p301_p4, %p297_p1 }
  0x23   : > { %305 = shalt.err (!%p302_p7)
}
  0x24   : > { %202 = dma.vmem_to_hbm [thread:$0]  (%p395_p5), %s127_s30, 128, %s129_s2, %s114_s3  }
  0x25 PF: > { %p214_p8 = scmp.ge.s32.totalorder %s344_s9, 2  ;;  %s140_s19 = sand.u32 1, %s332_s6  }
  0x26   : > { %s141_s20 = scalar_lea.sflag [#allocation4], %s140_s19 }
  0x27   : > { %p209_p9 = pnand %p214_p8, %p399_p6 }
  0x29   : > { %p210_p10 = pneg %p209_p9 }
  0x2b   : > { %327 = dma.done.wait (%p210_p10), %s141_s20, 128  }
  0x2c   : > { %329 = vsyncadd (%p210_p10), %s141_s20, 4294967168  ;;  %p12_p11 = scmp.ge.s32.totalorder %s382_s12, 4   ;;  %s445_s6 = smov %s336_s7 }
  0x2d   : > { %s446_s7 = smov %s340_s8  ;;  %s447_s8 = smov %s393_s15 }
  0x2e   : > { %s448_s9 = smov %s382_s12  ;;  %14 = sbr.rel (!%p12_p11) target bundleno = 4 (0x4), region = 61 }
  0x33   :  { %147 = vsyncpa [#allocation3], 1 }
  0x34   :  { %149 = vsyncpa [#allocation3 + $0x1], 1 }
  0x35   :  { %150 = vsyncpa [#allocation4], 1 }
  0x36   :  { %152 = vsyncpa [#allocation4 + $0x1], 1 }

// kernel: basic_layers_forward.1
= control target key start
LH: loop header
LB: loop body
LE: loop exit
PB: predicated region body
PF: predicated region fallthrough
CT: control target
= control target key end

     0   :  { %s1576_s30 = smov 0   ;;  %s1578_s10 = smov 0   ;;  %s1957_s0 = inlined_call_operand.vmem [shape: f32[2,256,8], index: 0, kind: input, shape index: {}, may-alias: {0,1,2}]   ;;  %s1958_s1 = inlined_call_operand.vmem [shape: f32[2,256,8], index: 1, kind: input, shape index: {}, may-alias: {0,1,2}]   ;;  %s1959_s2 = inlined_call_operand.vmem [shape: f32[2,256,8], index: 2, kind: input, shape index: {}, may-alias: {0,1,2}]   ;;  %s1960_s3 = inlined_call_operand.vmem [shape: f32[8,4], index: 3, kind: input, shape index: {}]   ;;  %s1961_s4 = inlined_call_operand.vmem [shape: f32[1,4], index: 4, kind: input, shape index: {}]   ;;  %s1962_s5 = inlined_call_operand.vmem [shape: f32[1,4], index: 5, kind: input, shape index: {}]   ;;  %s1963_s6 = inlined_call_operand.vmem [shape: f32[3,12,8], index: 6, kind: input, shape index: {}]   ;;  %s1964_s7 = inlined_call_operand.vmem [shape: f32[1,8], index: 7, kind: input, shape index: {}]   ;;  %s1965_s8 = inlined_call_operand.vmem [shape: f32[1,8], index: 8, kind: input, shape index: {}]   ;;  %s1966_s9 = inlined_call_operand.vmem [shape: f32[2,256,8], index: 9, kind: output, shape index: {}]  }
   0x1   :  { %s1580_s11 = smov 0   ;;  %s1582_s12 = smov 0  }
   0x2   :  { %s1584_s13 = smov 0  }
   0x3 LB: > { %s28_s14 = sadd.s32 1, %s1514_s11  ;;  %s31_s15 = sadd.s32 1, %s1518_s12  ;;  %s1522_s13 = sphi %s1584_s13, %s19_s13   ;;  %s1518_s12 = sphi %s1582_s12, %s1972_s12   ;;  %s1514_s11 = sphi %s1580_s11, %s1971_s11   ;;  %s1510_s10 = sphi %s1578_s10, %s1970_s10   ;;  %s1506_s30 = sphi %s1576_s30, %s1969_s30  }
   0x4   : > { %p29_p0 = scmp.ge.s32.totalorder %s28_s14, 4  ;;  %p1369_p1 = scmp.ge.s32.totalorder %s1522_s13, 1 }
   0x5   : > { %p374_p2 = scmp.lt.s32.totalorder %s1522_s13, 9 }
   0x6   : > { %s1974_s14 = smov (%p29_p0, %s28_s14), 0  ;;  %s1976_s15 = smov (!%p29_p0, %s31_s15), %s1518_s12 }
   0x7   : > { %p375_p3 = pnand %p1369_p1, %p374_p2  ;;  %p33_p4 = scmp.ge.s32.totalorder %s1976_s15, 2 }
   0x8   : > { %s1370_s18 = sshll.u32 (!%p375_p3), %s1506_s30, 3  ;;  %p445_p5 = scmp.lt.s32.totalorder (!%p375_p3), %s1510_s10, 1 }
   0x9   : > { %s1978_s15 = smov (%p33_p4, %s1976_s15), 0  ;;  %378 = sbr.rel (%p375_p3) target bundleno = 491 (0x1eb), region = 56 }
   0xa   : > { %p447_p6 = scmp.lt.s32.totalorder (!%p375_p3), %s1370_s18, 31  ;;  %s1373_s19 = sshll.u32 (!%p375_p3), %s1506_s30, 2 }
   0xb   : > { %s1435_s21 = sadd.s32 (!%p375_p3), 4, %s1373_s19  ;;  %s1374_s28 = sadd.s32 (!%p375_p3), 4294967295, %s1373_s19 }
   0xc   : > { %p474_p7 = scmp.lt.s32.totalorder (!%p375_p3), %s1435_s21, 15  ;;  %p456_p9 = scmp.gt.s32.totalorder (!%p375_p3), %s1374_s28, 0 }
   0xd   : > { %s1525_s16 = smov (!%p375_p3), 8   ;;  %p670_p11 = scmp.lt.s32.totalorder (!%p375_p3), %s1506_s30, 3 }
   0xe   : > { %v500_v0 = vld [vmem:[%s1960_s3] sm:$0xff]  ;;  %s1980_s10 = smov (!%p445_p5, %s1510_s10), 1  ;;  %s1982_s18 = smov (!%p447_p6, %s1370_s18), 31  ;;  %vm511_vm0 = vcmask 64512   ;;  %vm819_vm12 = vcmask 1043456   ;;  %vm775_vm15 = vcmask 31744  }
   0xf   : > { %551 = vmatpush.msra.mxu0 %v500_v0  ;;  %694 = vmatpush.msra.mxu2 %v500_v0  ;;  %s1613_s20 = sshll.u32 %s1980_s10, 5  ;;  %s1984_s21 = smov (!%p474_p7, %s1435_s21), 15  ;;  %v1679_v13 = vld [vmem:[%s1961_s4] ss:$0 sm:$0xff] }
  0x10   : > { %1437 = vmatpush.msra.mxu3 %v500_v0  ;;  %1436 = vmatpush.msra.mxu1 %v500_v0  ;;  %s450_s22 = sadd.s32 %s1613_s20, %s1982_s18  ;;  %s1379_s27 = sshll.u32 %s1984_s21, 1  ;;  %v1684_v14 = vld [vmem:[%s1962_s5] ss:$0 sm:$0xff] }
  0x11   : > { %647 = vmatpush.msrb.mxu0 %v500_v0  ;;  %s1616_s23 = sshll.u32 %s450_s22, 3  ;;  %p479_p8 = scmp.lt.s32.totalorder %s1379_s27, 31 }
  0x12   : > { %s1622_s26 = scalar_lea.vmem %s1957_s0, %s1616_s23  ;;  %s1988_s28 = smov (!%p456_p9, %s1374_s28), 0 }
  0x13   : > { %v1625_v1 = vld [vmem:[%s1622_s26] sm:$0xff]  ;;  %s1986_s27 = smov (!%p479_p8, %s1379_s27), 31  ;;  %v1630_v2 = vld [vmem:[%s1622_s26 + $0x8] sm:$0xff]  ;;  %v1636_v3 = vld [vmem:[%s1622_s26 + $0x10] sm:$0xff]  ;;  %s1375_s21 = sshll.u32 %s1988_s28, 1 }
  0x14   : > { %1385 = vmatmul.msk.f32.vlgmr.msra.gmra.mxu0 %vm511_vm0, %v1625_v1  ;;  %s482_s29 = sadd.s32 %s1613_s20, %s1986_s27  ;;  %p461_p10 = scmp.lt.s32.totalorder %s1375_s21, 31  ;;  %v1645_v5 = vld [vmem:[%s1622_s26 + $0x18] sm:$0xff]  ;;  %v1652_v7 = vld [vmem:[%s1622_s26 + $0x20] sm:$0xff]  ;;  %v1661_v9 = vld [vmem:[%s1622_s26 + $0x28] sm:$0xff] }
  0x15   : > { %s1381_s10 = sshll.u32 %s482_s29, 3  ;;  %v1666_v10 = vld [vmem:[%s1622_s26 + $0x30] sm:$0xff]  ;;  %v1671_v11 = vld [vmem:[%s1622_s26 + $0x38] sm:$0xff]  ;;  %s1524_s26 = smov 4  }
  0x16   : > { %s484_s18 = scalar_lea.vmem %s1959_s2, %s1381_s10  ;;  %s1990_s21 = smov (!%p461_p10, %s1375_s21), 31 }
  0x17   : > { %v671_v4 = vld [vmem:[%s484_s18] sm:$0xff]  ;;  %v672_v6 = vld [vmem:[%s484_s18 + $0x8] sm:$0xff]  ;;  %s464_s19 = sadd.s32 %s1613_s20, %s1990_s21  ;;  %p623_p12 = scmp.gt.s32.totalorder %s1506_s30, 0 }
  0x18   : > { %1395 = vmatmul.msk.f32.vlgmr.msra.gmra.mxu2 %vm511_vm0, %v671_v4  ;;  %1396 = vmatmul.msk.f32.vlgmr.msra.gmra.mxu3 %vm511_vm0, %v672_v6  ;;  %s1377_s22 = sshll.u32 %s464_s19, 3  ;;  %s1867_s24 = scalar_lea.vmem %s1966_s9, %s1616_s23 }
  0x19   : > { %s466_s27 = scalar_lea.vmem %s1958_s1, %s1377_s22 }
  0x1a   : > { %v625_v8 = vld [vmem:[%s466_s27 + $0x8] sm:$0xff]  ;;  %v624_v12 = vld [vmem:[%s466_s27] sm:$0xff]  ;;  %s712_s17 = scalar_select %p670_p11, 1, 0 }
  0x1b   : > { %1394 = vmatmul.msk.f32.vlgmr.msra.gmra.mxu1 %vm511_vm0, %v625_v8 }
  0x1c   : > { %1386 = vmatmul.msk.f32.gmra.mxu0 %vm511_vm0, %v1630_v2  ;;  %v713_v57 = vstv %s712_s17 }
  0x1d   : > { %vm714_vm9 = vcmp.eq.s32.totalorder %v713_v57, 1 }
  0x24   : > { %1387 = vmatmul.msk.f32.gmra.mxu0 %vm511_vm0, %v1636_v3 }
  0x2c   : > { %1388 = vmatmul.msk.f32.gmra.mxu0 %vm511_vm0, %v1645_v5 }
  0x34   : > { %1389 = vmatmul.msk.f32.gmra.mxu0 %vm511_vm0, %v1652_v7 }
  0x3c   : > { %1390 = vmatmul.msk.f32.gmra.mxu0 %vm511_vm0, %v1661_v9 }
  0x44   : > { %1391 = vmatmul.msk.f32.gmra.mxu0 %vm511_vm0, %v1666_v10 }
  0x4c   : > { %1392 = vmatmul.msk.f32.gmra.mxu0 %vm511_vm0, %v1671_v11 }
  0x54   : > { %1393 = vmatmul.msk.f32.vlgmr.msrb.gmra.mxu0 %vm511_vm0, %v624_v12  ;;  %v793_v12 = vld [vmem:[%s1963_s6 + $0x8] sm:$0xf] }
  0x55   : > { %1397 = vmatpush.msk.msrb.mxu3 %vm819_vm12, %v793_v12 }
  0x91   : > { %v553_v15 = vpop.f32.mrf.mxu0 }
  0x92   : > { %v580_v16 = vmul.f32 %v1679_v13, %v553_v15  ;;  %v792_v15 = vld [vmem:[%s1963_s6] sm:$0xff] }
  0x93   : > { %838 = vmatpush.msrb.mxu3 %v792_v15 }
  0x94   : > { %v591_v17 = vadd.f32 %v1684_v14, %v580_v16  ;;  %v1407_v16 = vld [vmem:[%s1963_s6 + $0x18] sm:$0xf] }
  0x95   : > { %1419 = vmatpush.msk.msrb.mxu2 %vm819_vm12, %v1407_v16 }
  0x96   : > { %vm599_vm1 = vcmp.gt.f32.partialorder %v591_v17, 0.0  ;;  %v607_v18 = vmul.f32 0.1, %v591_v17 }
  0x98   : > { %v1688_v19 = vsel %vm599_vm1, %v591_v17, %v607_v18  ;;  %v1409_v17 = vld [vmem:[%s1963_s6 + $0x28] sm:$0xf]  ;;  %v1408_v18 = vld [vmem:[%s1963_s6 + $0x20] sm:$0xff] }
  0x99   : > { %725 = vrot.lane.b32.xlu0 %v1688_v19, %s1524_s26  ;;  %v556_v20 = vpop.f32.mrf.mxu0  ;;  %1410 = vmatpush.msk.msrb.mxu1 %vm819_vm12, %v1409_v17 }
  0x9a   : > { %v581_v21 = vmul.f32 %v1679_v13, %v556_v20  ;;  %v1406_v20 = vld [vmem:[%s1963_s6 + $0x10] sm:$0xff] }
  0x9b   : > { %v696_v43 = vpop.f32.mrf.mxu2  ;;  %v699_v51 = vpop.f32.mrf.mxu3  ;;  %888 = vmatpush.msrb.mxu1 %v1408_v18  ;;  %1086 = vmatpush.msrb.mxu2 %v1406_v20 }
  0x9c   : > { %v592_v22 = vadd.f32 %v1684_v14, %v581_v21  ;;  %v702_v46 = vmul.f32 %v1679_v13, %v696_v43  ;;  %v703_v53 = vmul.f32 %v1679_v13, %v699_v51 }
  0x9e   : > { %vm600_vm2 = vcmp.gt.f32.partialorder %v592_v22, 0.0  ;;  %v608_v23 = vmul.f32 0.1, %v592_v22  ;;  %v704_v50 = vadd.f32 %v1684_v14, %v702_v46  ;;  %v705_v59 = vadd.f32 %v1684_v14, %v703_v53 }
  0xa0   : > { %v1694_v24 = vsel %vm600_vm2, %v592_v22, %v608_v23  ;;  %v708_v54 = vmul.f32 0.1, %v704_v50  ;;  %vm706_vm8 = vcmp.gt.f32.partialorder %v704_v50, 0.0  ;;  %v709_v63 = vmul.f32 0.1, %v705_v59 }
  0xa1   : > { %727 = vrot.lane.b32.xlu1 %v1694_v24, %s1524_s26  ;;  %v559_v25 = vpop.f32.mrf.mxu0  ;;  %vm707_vm11 = vcmp.gt.f32.partialorder %v705_v59, 0.0  ;;  %vm794_vm2 = vcmask 97280  }
  0xa2   : > { %v582_v26 = vmul.f32 %v1679_v13, %v559_v25  ;;  %v710_v61 = vsel %vm706_vm8, %v704_v50, %v708_v54  ;;  %v711_v6 = vsel %vm707_vm11, %v705_v59, %v709_v63  ;;  %v652_v25 = vpop.f32.mrf.mxu1 }
  0xa3   : > { %v715_v0 = vsel %vm714_vm9, %v710_v61, 0.0  ;;  %v716_v8 = vsel %vm714_vm9, %v711_v6, 0.0  ;;  %v914_v6 = vlaneseq }
  0xa4   : > { %v593_v27 = vadd.f32 %v1684_v14, %v582_v26 }
  0xa5   : > { %v1828_v15 = vshrl.u32 %v914_v6, 7 }
  0xa6   : > { %vm601_vm3 = vcmp.gt.f32.partialorder %v593_v27, 0.0  ;;  %v609_v28 = vmul.f32 0.1, %v593_v27 }
  0xa8   : > { %v1700_v29 = vsel %vm601_vm3, %v593_v27, %v609_v28  ;;  %v656_v27 = vmul.f32 %v1679_v13, %v652_v25  ;;  %vm1035_vm3 = vcmp.lt.s32.totalorder %v1828_v15, 1 }
  0xa9   : > { %729 = vrot.lane.b32.xlu2 %v1700_v29, %s1524_s26  ;;  %751 = vrot.lane.b32.xlu0 %v1700_v29, %s1525_s16  ;;  %v562_v30 = vpop.f32.mrf.mxu0 }
  0xaa   : > { %v583_v31 = vmul.f32 %v1679_v13, %v562_v30 }
  0xac   : > { %v594_v32 = vadd.f32 %v1684_v14, %v583_v31  ;;  %v658_v31 = vadd.f32 %v1684_v14, %v656_v27 }
  0xae   : > { %vm602_vm4 = vcmp.gt.f32.partialorder %v594_v32, 0.0  ;;  %v610_v33 = vmul.f32 0.1, %v594_v32  ;;  %vm660_vm1 = vcmp.gt.f32.partialorder %v658_v31, 0.0 }
  0xb0   : > { %v1708_v34 = vsel %vm602_vm4, %v594_v32, %v610_v33  ;;  %v1849_v32 = vld [vmem:[%s1964_s7] ss:$0 sm:$0xff] }
  0xb1   : > { %731 = vrot.lane.b32.xlu0 %v1708_v34, %s1524_s26  ;;  %753 = vrot.lane.b32.xlu1 %v1708_v34, %s1525_s16  ;;  %v565_v35 = vpop.f32.mrf.mxu0 }
  0xb2   : > { %v584_v36 = vmul.f32 %v1679_v13, %v565_v35 }
  0xb4   : > { %v595_v37 = vadd.f32 %v1684_v14, %v584_v36  ;;  %v662_v36 = vmul.f32 0.1, %v658_v31 }
  0xb6   : > { %vm603_vm5 = vcmp.gt.f32.partialorder %v595_v37, 0.0  ;;  %v611_v38 = vmul.f32 0.1, %v595_v37 }
  0xb8   : > { %v1716_v39 = vsel %vm603_vm5, %v595_v37, %v611_v38  ;;  %vm1128_vm5 = vcmp.lt.s32.totalorder %v1828_v15, 7 }
  0xb9   : > { %755 = vrot.lane.b32.xlu2 %v1716_v39, %s1525_s16  ;;  %v568_v40 = vpop.f32.mrf.mxu0 }
  0xba   : > { %v585_v41 = vmul.f32 %v1679_v13, %v568_v40 }
  0xbc   : > { %v596_v42 = vadd.f32 %v1684_v14, %v585_v41  ;;  %v664_v41 = vsel %vm660_vm1, %v658_v31, %v662_v36 }
  0xbe   : > { %vm604_vm6 = vcmp.gt.f32.partialorder %v596_v42, 0.0  ;;  %v612_v44 = vmul.f32 0.1, %v596_v42 }
  0xc0   : > { %v1722_v45 = vsel %vm604_vm6, %v596_v42, %v612_v44 }
  0xc1   : > { %733 = vrot.lane.b32.xlu2 %v1716_v39, %s1524_s26  ;;  %757 = vrot.lane.b32.xlu1 %v1722_v45, %s1525_s16  ;;  %v571_v47 = vpop.f32.mrf.mxu0 }
  0xc2   : > { %v586_v48 = vmul.f32 %v1679_v13, %v571_v47 }
  0xc4   : > { %v597_v49 = vadd.f32 %v1684_v14, %v586_v48 }
  0xc6   : > { %vm605_vm7 = vcmp.gt.f32.partialorder %v597_v49, 0.0  ;;  %v613_v52 = vmul.f32 0.1, %v597_v49 }
  0xc8   : > { %v621_v55 = vsel %vm605_vm7, %v597_v49, %v613_v52 }
  0xc9   : > { %735 = vrot.lane.b32.xlu1 %v1722_v45, %s1524_s26  ;;  %759 = vrot.lane.b32.xlu0 %v621_v55, %s1525_s16  ;;  %v574_v56 = vpop.f32.mrf.mxu0 }
  0xca   : > { %v587_v58 = vmul.f32 %v1679_v13, %v574_v56 }
  0xcc   : > { %v598_v60 = vadd.f32 %v1684_v14, %v587_v58 }
  0xce   : > { %vm606_vm10 = vcmp.gt.f32.partialorder %v598_v60, 0.0  ;;  %v614_v62 = vmul.f32 0.1, %v598_v60 }
  0xd0   : > { %v622_v4 = vsel %vm606_vm10, %v598_v60, %v614_v62 }
  0xd1   : > { %737 = vrot.lane.b32.xlu0 %v621_v55, %s1524_s26  ;;  %761 = vrot.lane.b32.xlu2 %v622_v4, %s1525_s16  ;;  %v649_v21 = vpop.f32.mrf.mxu0 }
  0xd2   : > { %763 = vrot.lane.b32.xlu1 %v715_v0, %s1525_s16  ;;  %v655_v22 = vmul.f32 %v1679_v13, %v649_v21 }
  0xd4   : > { %v657_v23 = vadd.f32 %v1684_v14, %v655_v22 }
  0xd6   : > { %v661_v26 = vmul.f32 0.1, %v657_v23  ;;  %vm659_vm13 = vcmp.gt.f32.partialorder %v657_v23, 0.0 }
  0xd8   : > { %v663_v33 = vsel %vm659_vm13, %v657_v23, %v661_v26  ;;  %v917_v23 = vadd.s32 16, %v1828_v15 }
  0xd9   : > { %765 = vrot.lane.b32.xlu0 %v716_v8, %s1525_s16  ;;  %739 = vrot.lane.b32.xlu2 %v622_v4, %s1524_s26  ;;  %s665_s16 = scalar_select %p623_p12, 1, 0 }
  0xdb   : > { %v666_v28 = vstv %s665_s16 }
  0xdc   : > { %vm1768_vm14 = vcmp.eq.s32.totalorder %v666_v28, 1 }
  0xdd   : > { %v668_v35 = vsel %vm1768_vm14, %v663_v33, 0.0  ;;  %v669_v14 = vsel %vm1768_vm14, %v664_v41, 0.0  ;;  %v941_v33 = vand.u32 15, %v917_v23 }
  0xdf   : > { %vm1021_vm6 = vcmp.ne.s32.totalorder %v941_v33, 0 }
 0x103   : > { %v730_v42 = vpop.permute.xlu2 %729 }
 0x104   : > { %v778_v48 = vsel %vm775_vm15, %v1688_v19, %v730_v42 }
 0x10b   : > { %v726_v30 = vpop.permute.xlu0 %725 }
 0x10c   : > { %v776_v37 = vsel %vm775_vm15, %v668_v35, %v726_v30 }
 0x113   : > { %v728_v13 = vpop.permute.xlu1 %727  ;;  %v756_v47 = vpop.permute.xlu2 %755 }
 0x114   : > { %v777_v43 = vsel %vm775_vm15, %v669_v14, %v728_v13  ;;  %v786_v49 = vsel %vm511_vm0, %v778_v48, %v756_v47 }
 0x11b   : > { %v752_v38 = vpop.permute.xlu0 %751  ;;  %v734_v19 = vpop.permute.xlu2 %733 }
 0x11c   : > { %v784_v40 = vsel %vm511_vm0, %v776_v37, %v752_v38  ;;  %v780_v54 = vsel %vm775_vm15, %v1700_v29, %v734_v19  ;;  %v1854_v37 = vld [vmem:[%s1965_s8] ss:$0 sm:$0xff] }
 0x11d   : > { %1398 = vmatmul.msk.f32.vlgmr.msrb.gmra.mxu3 %vm794_vm2, %v784_v40  ;;  %1411 = vmatmul.msk.f32.vlgmr.msrb.gmra.mxu1 %vm794_vm2, %v784_v40 }
 0x11e   : > { %1420 = vmatmul.msk.f32.vlgmr.msrb.gmra.mxu2 %vm794_vm2, %v784_v40 }
 0x123   : > { %v754_v44 = vpop.permute.xlu1 %753  ;;  %v732_v50 = vpop.permute.xlu0 %731 }
 0x124   : > { %v785_v46 = vsel %vm511_vm0, %v777_v43, %v754_v44  ;;  %v779_v51 = vsel %vm775_vm15, %v1694_v24, %v732_v50 }
 0x125   : > { %1399 = vmatmul.msk.f32.gmra.mxu3 %vm794_vm2, %v785_v46  ;;  %1412 = vmatmul.msk.f32.gmra.mxu1 %vm794_vm2, %v785_v46 }
 0x126   : > { %1421 = vmatmul.msk.f32.gmra.mxu2 %vm794_vm2, %v785_v46  ;;  %v918_v46 = vadd.s32 24, %v1828_v15 }
 0x12b   : > { %v762_v58 = vpop.permute.xlu2 %761 }
 0x12d   : > { %1400 = vmatmul.msk.f32.gmra.mxu3 %vm794_vm2, %v786_v49  ;;  %1413 = vmatmul.msk.f32.gmra.mxu1 %vm794_vm2, %v786_v49 }
 0x12e   : > { %1422 = vmatmul.msk.f32.gmra.mxu2 %vm794_vm2, %v786_v49 }
 0x133   : > { %v758_v52 = vpop.permute.xlu1 %757 }
 0x134   : > { %v787_v53 = vsel %vm511_vm0, %v779_v51, %v758_v52 }
 0x135   : > { %1401 = vmatmul.msk.f32.gmra.mxu3 %vm794_vm2, %v787_v53  ;;  %1414 = vmatmul.msk.f32.gmra.mxu1 %vm794_vm2, %v787_v53 }
 0x136   : > { %1423 = vmatmul.msk.f32.gmra.mxu2 %vm794_vm2, %v787_v53  ;;  %v948_v53 = vand.u32 15, %v918_v46 }
 0x138   : > { %vm1115_vm8 = vcmp.ne.s32.totalorder %v948_v53, 15 }
 0x13b   : > { %v760_v55 = vpop.permute.xlu0 %759  ;;  %v736_v24 = vpop.permute.xlu1 %735 }
 0x13c   : > { %v788_v56 = vsel %vm511_vm0, %v780_v54, %v760_v55  ;;  %v781_v57 = vsel %vm775_vm15, %v1708_v34, %v736_v24  ;;  %v740_v34 = vpop.permute.xlu2 %739 }
 0x13d   : > { %1402 = vmatmul.msk.f32.gmra.mxu3 %vm794_vm2, %v788_v56  ;;  %1415 = vmatmul.msk.f32.gmra.mxu1 %vm794_vm2, %v788_v56  ;;  %v789_v59 = vsel %vm511_vm0, %v781_v57, %v762_v58  ;;  %v783_v0 = vsel %vm775_vm15, %v1722_v45, %v740_v34  ;;  %v916_v45 = vadd.s32 8, %v1828_v15  ;;  %v919_v57 = vadd.s32 32, %v1828_v15 }
 0x13e   : > { %1424 = vmatmul.msk.f32.gmra.mxu2 %vm794_vm2, %v788_v56 }
 0x13f   : > { %v934_v17 = vand.u32 15, %v916_v45  ;;  %v955_v34 = vand.u32 15, %v919_v57 }
 0x141   : > { %vm1113_vm4 = vcmp.ne.s32.totalorder %v934_v17, 15  ;;  %vm1023_vm10 = vcmp.ne.s32.totalorder %v955_v34, 0 }
 0x143   : > { %v738_v29 = vpop.permute.xlu0 %737 }
 0x144   : > { %v782_v60 = vsel %vm775_vm15, %v1716_v39, %v738_v29  ;;  %v764_v61 = vpop.permute.xlu1 %763 }
 0x145   : > { %1403 = vmatmul.msk.f32.gmra.mxu3 %vm794_vm2, %v789_v59  ;;  %1416 = vmatmul.msk.f32.gmra.mxu1 %vm794_vm2, %v789_v59  ;;  %v790_v62 = vsel %vm511_vm0, %v782_v60, %v764_v61 }
 0x146   : > { %1425 = vmatmul.msk.f32.gmra.mxu2 %vm794_vm2, %v789_v59 }
 0x14b   : > { %v766_v63 = vpop.permute.xlu0 %765 }
 0x14c   : > { %v791_v4 = vsel %vm511_vm0, %v783_v0, %v766_v63 }
 0x14d   : > { %1404 = vmatmul.msk.f32.gmra.mxu3 %vm794_vm2, %v790_v62  ;;  %1417 = vmatmul.msk.f32.gmra.mxu1 %vm794_vm2, %v790_v62 }
 0x14e   : > { %1426 = vmatmul.msk.f32.gmra.mxu2 %vm794_vm2, %v790_v62 }
 0x155   : > { %1405 = vmatmul.msk.f32.gmra.mxu3 %vm794_vm2, %v791_v4  ;;  %1418 = vmatmul.msk.f32.gmra.mxu1 %vm794_vm2, %v791_v4 }
 0x156   : > { %1427 = vmatmul.msk.f32.gmra.mxu2 %vm794_vm2, %v791_v4 }
 0x19a   : > { %v1822_v39 = vpop.f32.mrf.mxu1 }
 0x1a0   : > { %v1824_v8 = vpop.f32.mrf.mxu3 }
 0x1a1   : > { %v1826_v12 = vpop.f32.mrf.mxu2  ;;  %v1027_v20 = vrot.slane %v1824_v8, 7 }
 0x1a2   : > { %v1830_v16 = vpop.f32.mrf.mxu1 }
 0x1a3   : > { %v1121_v26 = vrot.slane %v1830_v16, 1 }
 0x1a8   : > { %v843_v18 = vpop.f32.mrf.mxu3 }
 0x1a9   : > { %v1028_v21 = vrot.slane %v843_v18, 7  ;;  %v1091_v22 = vpop.f32.mrf.mxu2 }
 0x1aa   : > { %v896_v25 = vpop.f32.mrf.mxu1 }
 0x1ab   : > { %v1042_v27 = vsel %vm1035_vm3, %v1027_v20, %v1028_v21  ;;  %v1122_v28 = vrot.slane %v896_v25, 1 }
 0x1ac   : > { %v1092_v30 = vadd.f32 %v1091_v22, %v1042_v27 }
 0x1ad   : > { %v1134_v31 = vsel %vm1128_vm5, %v1121_v26, %v1122_v28 }
 0x1ae   : > { %v1154_v35 = vsel %vm1113_vm4, %v1134_v31, 0.0 }
 0x1af   : > { %v1162_v36 = vadd.f32 %v1154_v35, %v1092_v30 }
 0x1b0   : > { %v846_v13 = vpop.f32.mrf.mxu3 }
 0x1b1   : > { %v1174_v38 = vmul.f32 %v1849_v32, %v1162_v36  ;;  %v1029_v40 = vrot.slane %v846_v13, 7  ;;  %v1094_v41 = vpop.f32.mrf.mxu2 }
 0x1b2   : > { %v899_v14 = vpop.f32.mrf.mxu1 }
 0x1b3   : > { %v1186_v42 = vadd.f32 %v1854_v37, %v1174_v38  ;;  %v1041_v43 = vsel %vm1035_vm3, %v1028_v21, %v1029_v40  ;;  %v1123_v44 = vrot.slane %v899_v14, 1 }
 0x1b4   : > { %v1062_v47 = vsel %vm1021_vm6, %v1041_v43, 0.0  ;;  %v921_v43 = vadd.s32 48, %v1828_v15 }
 0x1b5   : > { %vm1194_vm7 = vcmp.gt.f32.partialorder %v1186_v42, 0.0  ;;  %v1202_v48 = vmul.f32 0.1, %v1186_v42  ;;  %v1095_v49 = vadd.f32 %v1094_v41, %v1062_v47  ;;  %v1133_v50 = vsel %vm1128_vm5, %v1122_v28, %v1123_v44 }
 0x1b6   : > { %v920_v28 = vadd.s32 40, %v1828_v15 }
 0x1b7   : > { %v1210_v51 = vsel %vm1194_vm7, %v1186_v42, %v1202_v48  ;;  %v1163_v52 = vadd.f32 %v1133_v50, %v1095_v49 }
 0x1b8   : > { %v1218_v19 = vadd.f32 %v1210_v51, %v1630_v2  ;;  %v849_v54 = vpop.f32.mrf.mxu3  ;;  %v962_v13 = vand.u32 15, %v920_v28  ;;  %v969_v51 = vand.u32 15, %v921_v43 }
 0x1b9   : > { %v1175_v55 = vmul.f32 %v1849_v32, %v1163_v52  ;;  %v1030_v56 = vrot.slane %v849_v54, 7  ;;  %v1097_v24 = vpop.f32.mrf.mxu2 }
 0x1ba   : > { %1226 = vst.msk [vmem:[%s1867_s24 + $0x8] sm:$0xff] %vm511_vm0, %v1218_v19  ;;  %v902_v58 = vpop.f32.mrf.mxu1  ;;  %vm1117_vm12 = vcmp.ne.s32.totalorder %v962_v13, 15  ;;  %vm1025_vm14 = vcmp.ne.s32.totalorder %v969_v51, 0 }
 0x1bb   : > { %v1187_v59 = vadd.f32 %v1854_v37, %v1175_v55  ;;  %v1040_v29 = vsel %vm1035_vm3, %v1029_v40, %v1030_v56  ;;  %v1124_v60 = vrot.slane %v902_v58, 1 }
 0x1bc   : > { %v1098_v61 = vadd.f32 %v1097_v24, %v1040_v29 }
 0x1bd   : > { %vm1195_vm9 = vcmp.gt.f32.partialorder %v1187_v59, 0.0  ;;  %v1203_v2 = vmul.f32 0.1, %v1187_v59  ;;  %v1132_v62 = vsel %vm1128_vm5, %v1123_v44, %v1124_v60 }
 0x1be   : > { %v1156_v63 = vsel %vm1115_vm8, %v1132_v62, 0.0 }
 0x1bf   : > { %v1211_v0 = vsel %vm1195_vm9, %v1187_v59, %v1203_v2  ;;  %v1164_v4 = vadd.f32 %v1156_v63, %v1098_v61  ;;  %v922_v59 = vadd.s32 56, %v1828_v15 }
 0x1c0   : > { %v1219_v6 = vadd.f32 %v1211_v0, %v1636_v3  ;;  %v852_v45 = vpop.f32.mrf.mxu3 }
 0x1c1   : > { %v1176_v17 = vmul.f32 %v1849_v32, %v1164_v4  ;;  %v1031_v18 = vrot.slane %v852_v45, 7  ;;  %v1100_v21 = vpop.f32.mrf.mxu2  ;;  %v976_v0 = vand.u32 15, %v922_v59  ;;  %v1120_v45 = vrot.slane %v1822_v39, 1 }
 0x1c2   : > { %1227 = vst.msk [vmem:[%s1867_s24 + $0x10] sm:$0xff] %vm511_vm0, %v1219_v6  ;;  %v905_v22 = vpop.f32.mrf.mxu1 }
 0x1c3   : > { %v1188_v23 = vadd.f32 %v1854_v37, %v1176_v17  ;;  %v1039_v25 = vsel %vm1035_vm3, %v1030_v56, %v1031_v18  ;;  %v1125_v27 = vrot.slane %v905_v22, 1  ;;  %vm1119_vm2 = vcmp.ne.s32.totalorder %v976_v0, 15 }
 0x1c4   : > { %v1064_v30 = vsel %vm1023_vm10, %v1039_v25, 0.0  ;;  %v1135_v8 = vsel %vm1128_vm5, %v1120_v45, %v1121_v26 }
 0x1c5   : > { %vm1196_vm11 = vcmp.gt.f32.partialorder %v1188_v23, 0.0  ;;  %v1204_v3 = vmul.f32 0.1, %v1188_v23  ;;  %v1101_v31 = vadd.f32 %v1100_v21, %v1064_v30  ;;  %v1131_v33 = vsel %vm1128_vm5, %v1124_v60, %v1125_v27 }
 0x1c7   : > { %v1212_v35 = vsel %vm1196_vm11, %v1188_v23, %v1204_v3  ;;  %v1165_v36 = vadd.f32 %v1131_v33, %v1101_v31 }
 0x1c8   : > { %v1220_v38 = vadd.f32 %v1212_v35, %v1645_v5  ;;  %v855_v40 = vpop.f32.mrf.mxu3 }
 0x1c9   : > { %v1177_v41 = vmul.f32 %v1849_v32, %v1165_v36  ;;  %v1032_v14 = vrot.slane %v855_v40, 7  ;;  %v1103_v42 = vpop.f32.mrf.mxu2 }
 0x1ca   : > { %1228 = vst.msk [vmem:[%s1867_s24 + $0x18] sm:$0xff] %vm511_vm0, %v1220_v38  ;;  %v908_v44 = vpop.f32.mrf.mxu1 }
 0x1cb   : > { %v1189_v46 = vadd.f32 %v1854_v37, %v1177_v41  ;;  %v1038_v47 = vsel %vm1035_vm3, %v1031_v18, %v1032_v14  ;;  %v1126_v48 = vrot.slane %v908_v44, 1 }
 0x1cc   : > { %v1104_v49 = vadd.f32 %v1103_v42, %v1038_v47 }
 0x1cd   : > { %vm1197_vm13 = vcmp.gt.f32.partialorder %v1189_v46, 0.0  ;;  %v1205_v5 = vmul.f32 0.1, %v1189_v46  ;;  %v1130_v50 = vsel %vm1128_vm5, %v1125_v27, %v1126_v48 }
 0x1ce   : > { %v1158_v52 = vsel %vm1117_vm12, %v1130_v50, 0.0 }
 0x1cf   : > { %v1213_v53 = vsel %vm1197_vm13, %v1189_v46, %v1205_v5  ;;  %v1166_v19 = vadd.f32 %v1158_v52, %v1104_v49 }
 0x1d0   : > { %v1221_v54 = vadd.f32 %v1213_v53, %v1652_v7  ;;  %v858_v55 = vpop.f32.mrf.mxu3  ;;  %v927_v7 = vand.u32 15, %v1828_v15 }
 0x1d1   : > { %v1178_v56 = vmul.f32 %v1849_v32, %v1166_v19  ;;  %v1033_v24 = vrot.slane %v858_v55, 7  ;;  %v1106_v57 = vpop.f32.mrf.mxu2 }
 0x1d2   : > { %1229 = vst.msk [vmem:[%s1867_s24 + $0x20] sm:$0xff] %vm511_vm0, %v1221_v54  ;;  %v911_v58 = vpop.f32.mrf.mxu1  ;;  %vm1019_vm1 = vcmp.ne.s32.totalorder %v927_v7, 0 }
 0x1d3   : > { %v1190_v29 = vadd.f32 %v1854_v37, %v1178_v56  ;;  %v1037_v60 = vsel %vm1035_vm3, %v1032_v14, %v1033_v24  ;;  %v1127_v61 = vrot.slane %v911_v58, 1 }
 0x1d4   : > { %v1066_v2 = vsel %vm1025_vm14, %v1037_v60, 0.0 }
 0x1d5   : > { %vm1198_vm15 = vcmp.gt.f32.partialorder %v1190_v29, 0.0  ;;  %v1206_v62 = vmul.f32 0.1, %v1190_v29  ;;  %v1107_v34 = vadd.f32 %v1106_v57, %v1066_v2  ;;  %v1129_v63 = vsel %vm1128_vm5, %v1126_v48, %v1127_v61 }
 0x1d6   : > { %v1136_v23 = vsel %vm1128_vm5, %v1127_v61, %v1120_v45 }
 0x1d7   : > { %v1214_v4 = vsel %vm1198_vm15, %v1190_v29, %v1206_v62  ;;  %v1167_v6 = vadd.f32 %v1129_v63, %v1107_v34  ;;  %v1160_v33 = vsel %vm1119_vm2, %v1136_v23, 0.0 }
 0x1d8   : > { %v1222_v17 = vadd.f32 %v1214_v4, %v1661_v9  ;;  %v861_v18 = vpop.f32.mrf.mxu3 }
 0x1d9   : > { %v1179_v21 = vmul.f32 %v1849_v32, %v1167_v6  ;;  %v1034_v22 = vrot.slane %v861_v18, 7  ;;  %v1109_v27 = vpop.f32.mrf.mxu2 }
 0x1da   : > { %1230 = vst.msk [vmem:[%s1867_s24 + $0x28] sm:$0xff] %vm511_vm0, %v1222_v17 }
 0x1db   : > { %v1191_v25 = vadd.f32 %v1854_v37, %v1179_v21  ;;  %v1043_v39 = vsel %vm1035_vm3, %v1034_v22, %v1027_v20  ;;  %v1036_v9 = vsel %vm1035_vm3, %v1033_v24, %v1034_v22 }
 0x1dc   : > { %v1060_v28 = vsel %vm1019_vm1, %v1043_v39, 0.0  ;;  %v1110_v30 = vadd.f32 %v1109_v27, %v1036_v9 }
 0x1dd   : > { %vm1199_vm4 = vcmp.gt.f32.partialorder %v1191_v25, 0.0  ;;  %v1207_v3 = vmul.f32 0.1, %v1191_v25  ;;  %v1089_v31 = vadd.f32 %v1826_v12, %v1060_v28 }
 0x1de   : > { %v1168_v35 = vadd.f32 %v1160_v33, %v1110_v30 }
 0x1df   : > { %v1215_v36 = vsel %vm1199_vm4, %v1191_v25, %v1207_v3  ;;  %v1161_v20 = vadd.f32 %v1135_v8, %v1089_v31 }
 0x1e0   : > { %v1223_v13 = vadd.f32 %v1215_v36, %v1666_v10  ;;  %v1180_v38 = vmul.f32 %v1849_v32, %v1168_v35 }
 0x1e1   : > { %v1173_v40 = vmul.f32 %v1849_v32, %v1161_v20 }
 0x1e2   : > { %1231 = vst.msk [vmem:[%s1867_s24 + $0x30] sm:$0xff] %vm511_vm0, %v1223_v13  ;;  %v1192_v12 = vadd.f32 %v1854_v37, %v1180_v38 }
 0x1e3   : > { %v1185_v16 = vadd.f32 %v1854_v37, %v1173_v40 }
 0x1e4   : > { %vm1200_vm3 = vcmp.gt.f32.partialorder %v1192_v12, 0.0  ;;  %v1208_v15 = vmul.f32 0.1, %v1192_v12 }
 0x1e5   : > { %vm1193_vm5 = vcmp.gt.f32.partialorder %v1185_v16, 0.0  ;;  %v1201_v26 = vmul.f32 0.1, %v1185_v16 }
 0x1e6   : > { %v1216_v41 = vsel %vm1200_vm3, %v1192_v12, %v1208_v15 }
 0x1e7   : > { %v1209_v14 = vsel %vm1193_vm5, %v1185_v16, %v1201_v26  ;;  %v1224_v42 = vadd.f32 %v1216_v41, %v1671_v11 }
 0x1e8   : > { %v1217_v10 = vadd.f32 %v1209_v14, %v1625_v1 }
 0x1e9   : > { %1232 = vst.msk [vmem:[%s1867_s24 + $0x38] sm:$0xff] %vm511_vm0, %v1224_v42 }
 0x1ea   : > { %1225 = vst.msk [vmem:[%s1867_s24] sm:$0xff] %vm511_vm0, %v1217_v10 }
 0x1eb PF: > { %s19_s13 = sadd.s32 1, %s1522_s13   ;;  %s1969_s30 = smov %s1514_s11 }
 0x1ec   : > { %p16_p13 = scmp.ge.s32.totalorder %s19_s13, 10   ;;  %s1970_s10 = smov %s1518_s12 }
 0x1ed   : > { %s1971_s11 = smov %s1974_s14  ;;  %s1972_s12 = smov %s1978_s15 }
 0x1ee   :  { %18 = sbr.rel (!%p16_p13) target bundleno = 3 (0x3), region = 94 }

</bundles_post_ra>
